<compile_context>
chip_gen: v5e
topology: v5e:2x2
jax: 0.10.0
libtpu: 0.0.40
codegen_flags: <defaults>
</compile_context>

<pallas_src>
import functools

import jax
import jax.numpy as jnp
from jax.experimental import pallas as pl
from jax.experimental.pallas import tpu as pltpu


def _round_up(x, m):
    return (x + m - 1) // m * m


def _cdiv(a, b):
    return (a + b - 1) // b


def _choose_tile(dim, default, align, prefer_multi_block=False):
    """Pick (tile, padded_extent) for one axis.

    Tile is a multiple of `align`. If the aligned dim fits inside one default
    tile we use it directly (no rounding up to the full default tile); larger
    dims are split into near-equal aligned tiles so per-axis padding stays
    small. With prefer_multi_block, a dim that fits in one tile is split into
    >=2 exact blocks (never adds padding) so both v7x TCs get parallel work.
    """
    aligned = _round_up(dim, align)
    if aligned <= default:
        if prefer_multi_block and aligned >= 2 * align:
            t = (aligned // 2) // align * align
            while t >= align:
                if aligned % t == 0:
                    return t, aligned
                t -= align
        return aligned, aligned
    n_blocks = _cdiv(aligned, default)
    tile = _round_up(_cdiv(aligned, n_blocks), align)
    return tile, tile * n_blocks


def linear_kernel(x_ref, w_ref, b_ref, o_ref, acc_ref):
    """One (tm, tn) output tile; K is reduced across grid axis 2 ("arbitrary")."""
    k = pl.program_id(2)

    @pl.when(k == 0)
    def _zero():
        acc_ref[...] = jnp.zeros_like(acc_ref)

    # bf16 x bf16 -> f32 accumulate on the MXU fast path.
    acc_ref[...] += jnp.dot(
        x_ref[...], w_ref[...], preferred_element_type=jnp.float32
    )

    @pl.when(k == pl.num_programs(2) - 1)
    def _finalize():
        # f32 epilogue: single bias add + cast to output dtype.
        o_ref[...] = (acc_ref[...] + b_ref[...]).astype(o_ref.dtype)


@functools.partial(
    jax.jit, static_argnames=("n_out", "tn", "tk", "tm_default", "compute_dtype")
)
def linear_forward(x, w_padded, b_padded, *, n_out, tn, tk, tm_default=512,
                   compute_dtype=jnp.bfloat16):
    """x: [M, K]; w_padded: [Kp, Np] in compute_dtype; b_padded: [1, Np] f32."""
    M, K = x.shape
    Kp, Np = w_padded.shape
    out_dtype = x.dtype

    tm, Mp = _choose_tile(M, tm_default, 8)

    # Only x is padded/cast per call; padded K columns are exact zeros so they
    # contribute nothing to the accumulation.
    xp = x.astype(compute_dtype)
    if Mp != M or Kp != K:
        xp = jnp.pad(xp, ((0, Mp - M), (0, Kp - K)))

    grid = (Mp // tm, Np // tn, Kp // tk)

    itemsize = jnp.dtype(compute_dtype).itemsize
    cost = pl.CostEstimate(
        flops=2 * Mp * Np * Kp,
        transcendentals=0,
        bytes_accessed=(Mp * Kp + Kp * Np) * itemsize + Np * 4 + Mp * Np * 4,
    )

    out_padded = pl.pallas_call(
        linear_kernel,
        out_shape=jax.ShapeDtypeStruct((Mp, Np), out_dtype),
        grid_spec=pltpu.PrefetchScalarGridSpec(
            num_scalar_prefetch=0,
            grid=grid,
            in_specs=[
                pl.BlockSpec((tm, tk), lambda i, j, k: (i, k)),   # x tile (bf16)
                # TODO(synk): if profiling shows exposed DMA on the W stream,
                # add pipeline_mode=pl.Buffered(3) to this spec.
                pl.BlockSpec((tk, tn), lambda i, j, k: (k, j)),   # W tile (bf16)
                pl.BlockSpec((1, tn), lambda i, j, k: (0, j)),    # bias tile (f32)
            ],
            out_specs=pl.BlockSpec((tm, tn), lambda i, j, k: (i, j)),
            scratch_shapes=[pltpu.VMEM((tm, tn), jnp.float32)],
        ),
        compiler_params=pltpu.CompilerParams(
            dimension_semantics=("parallel", "parallel", "arbitrary"),
            # bf16 512x512x1024 tiles double-buffer to ~7 MiB; 48 MiB leaves
            # headroom under v7x's 64 MiB physical VMEM (v5e/v6e have 128 MiB).
            vmem_limit_bytes=48 * 1024 * 1024,
        ),
        cost_estimate=cost,
    )(xp, w_padded, b_padded)

    if Mp == M and Np == n_out:
        return out_padded
    return out_padded[:M, :n_out]


class LinearLayer:
    """JAX/Pallas port of the PyTorch LinearLayer (nn.Sequential(nn.Linear))."""

    def __init__(self, in_dim, out_dim, key, *, compute_dtype=jnp.bfloat16,
                 tn_default=512, tk_default=1024):
        # kaiming_normal_(mode='fan_in', nonlinearity='relu'):
        #   std = sqrt(2 / fan_in); bias filled with 0.0
        std = (2.0 / in_dim) ** 0.5
        w_torch_layout = jax.random.normal(key, (out_dim, in_dim), jnp.float32) * std
        w = jnp.transpose(w_torch_layout)               # [in_dim, out_dim]
        b = jnp.zeros((1, out_dim), jnp.float32)        # [1, out_dim]

        self.n_out = out_dim
        self.compute_dtype = compute_dtype
        # Fix K/N tiles at init and pad + cast the static weight ONCE (keeps
        # the per-call critical path free of a full W copy in HBM).
        self.tk, Kp = _choose_tile(in_dim, tk_default, 128)
        self.tn, Np = _choose_tile(out_dim, tn_default, 128, prefer_multi_block=True)
        self.w = jnp.pad(
            w, ((0, Kp - in_dim), (0, Np - out_dim))
        ).astype(compute_dtype)                         # [Kp, Np] bf16
        self.b = jnp.pad(b, ((0, 0), (0, Np - out_dim)))  # [1, Np] f32

    def __call__(self, x):
        return linear_forward(
            x, self.w, self.b,
            n_out=self.n_out, tn=self.tn, tk=self.tk,
            compute_dtype=self.compute_dtype,
        )


if __name__ == "__main__":
    key = jax.random.PRNGKey(0)
    k_w, k_x, k_w2, k_x2 = jax.random.split(key, 4)

    # --- 1) Small demo shapes implied by the module ---
    batch, in_dim, out_dim = 8, 32, 16
    model = LinearLayer(in_dim, out_dim, k_w)
    x = jax.random.normal(k_x, (batch, in_dim), jnp.float32)

    y = jax.block_until_ready(model(x))
    # Reference on the same bf16-input / f32-accumulate path as the kernel.
    y_ref = (
        jnp.dot(x.astype(jnp.bfloat16), model.w[:in_dim, :out_dim],
                preferred_element_type=jnp.float32)
        + model.b[:, :out_dim]
    )
    assert y.shape == (batch, out_dim)
    assert jnp.allclose(y, y_ref, atol=2e-2, rtol=2e-2), float(
        jnp.max(jnp.abs(y - y_ref))
    )

    # --- 2) Larger, non-128-aligned shape: multi-tile N, no K/N tile rounding ---
    b2, in2, out2 = 32, 640, 384
    model2 = LinearLayer(in2, out2, k_w2)
    x2 = jax.random.normal(k_x2, (b2, in2), jnp.float32)

    y2 = jax.block_until_ready(model2(x2))
    y2_ref = (
        jnp.dot(x2.astype(jnp.bfloat16), model2.w[:in2, :out2],
                preferred_element_type=jnp.float32)
        + model2.b[:, :out2]
    )
    assert y2.shape == (b2, out2)
    assert jnp.allclose(y2, y2_ref, atol=2e-2, rtol=2e-2), float(
        jnp.max(jnp.abs(y2 - y2_ref))
    )

    print("KERNEL_OK")
</pallas_src>

<mosaic_0001>
module attributes {stable_mosaic.version = 11 : i64} {
  func.func @linear_kernel(%arg0: i32, %arg1: i32, %arg2: i32, %arg3: memref<8x128xbf16, #tpu.memory_space<vmem>>, %arg4: memref<128x128xbf16, #tpu.memory_space<vmem>>, %arg5: memref<1x128xf32, #tpu.memory_space<vmem>>, %arg6: memref<8x128xf32, #tpu.memory_space<vmem>>, %arg7: memref<8x128xf32, #tpu.memory_space<vmem>>) attributes {dimension_semantics = [#tpu.dimension_semantics<parallel>, #tpu.dimension_semantics<parallel>, #tpu.dimension_semantics<arbitrary>], iteration_bounds = array<i64: 1, 1, 1>, scalar_prefetch = 0 : i64, scratch_operands = 1 : i64, tpu.core_type = #tpu.core_type<tc>, window_params = [{transform_indices = @transform_0, window_bounds = array<i64: 8, 128>}, {transform_indices = @transform_1, window_bounds = array<i64: 128, 128>}, {transform_indices = @transform_2, window_bounds = array<i64: 1, 128>}, {transform_indices = @transform_3, window_bounds = array<i64: 8, 128>}]} {
    %c0_i32 = arith.constant 0 : i32
    %0 = arith.cmpi eq, %arg2, %c0_i32 : i32
    %1 = arith.extui %0 : i1 to i32
    %c0_i32_0 = arith.constant 0 : i32
    %2 = arith.cmpi ne, %1, %c0_i32_0 : i32
    scf.if %2 {
      %cst_10 = arith.constant 0.000000e+00 : f32
      %12 = vector.broadcast %cst_10 : f32 to vector<8x128xf32>
      %c0_11 = arith.constant 0 : index
      %c0_12 = arith.constant 0 : index
      %13 = vector.load %arg7[%c0_11, %c0_12] : memref<8x128xf32, #tpu.memory_space<vmem>>, vector<8x128xf32>
      tpu.vector_store %arg7[%c0_11, %c0_12], %12 {strides = array<i32>} : memref<8x128xf32, #tpu.memory_space<vmem>>, vector<8x128xf32>,
    } else {
    }
    %c0 = arith.constant 0 : index
    %c0_1 = arith.constant 0 : index
    %3 = vector.load %arg7[%c0, %c0_1] : memref<8x128xf32, #tpu.memory_space<vmem>>, vector<8x128xf32>
    %c0_2 = arith.constant 0 : index
    %c0_3 = arith.constant 0 : index
    %4 = vector.load %arg3[%c0_2, %c0_3] : memref<8x128xbf16, #tpu.memory_space<vmem>>, vector<8x128xbf16>
    %c0_4 = arith.constant 0 : index
    %c0_5 = arith.constant 0 : index
    %5 = vector.load %arg4[%c0_4, %c0_5] : memref<128x128xbf16, #tpu.memory_space<vmem>>, vector<128x128xbf16>
    %cst = arith.constant dense<0.000000e+00> : vector<8x128xf32>
    %6 = tpu.matmul %4, %5, %cst {dimension_numbers = #tpu.dot_dimension_numbers<[1], [0], [0], [1], [0, 0, 1, 1], [], []>} : vector<8x128xbf16>, vector<128x128xbf16>, vector<8x128xf32> -> vector<8x128xf32>
    %7 = arith.addf %3, %6 : vector<8x128xf32>
    %c0_6 = arith.constant 0 : index
    %c0_7 = arith.constant 0 : index
    %8 = vector.load %arg7[%c0_6, %c0_7] : memref<8x128xf32, #tpu.memory_space<vmem>>, vector<8x128xf32>
    tpu.vector_store %arg7[%c0_6, %c0_7], %7 {strides = array<i32>} : memref<8x128xf32, #tpu.memory_space<vmem>>, vector<8x128xf32>,
    %c0_i32_8 = arith.constant 0 : i32
    %9 = arith.cmpi eq, %arg2, %c0_i32_8 : i32
    %10 = arith.extui %9 : i1 to i32
    %c0_i32_9 = arith.constant 0 : i32
    %11 = arith.cmpi ne, %10, %c0_i32_9 : i32
    scf.if %11 {
      %c0_10 = arith.constant 0 : index
      %c0_11 = arith.constant 0 : index
      %12 = vector.load %arg7[%c0_10, %c0_11] : memref<8x128xf32, #tpu.memory_space<vmem>>, vector<8x128xf32>
      %c0_12 = arith.constant 0 : index
      %c0_13 = arith.constant 0 : index
      %13 = vector.load %arg5[%c0_12, %c0_13] : memref<1x128xf32, #tpu.memory_space<vmem>>, vector<1x128xf32>
      %14 = vector.broadcast %13 : vector<1x128xf32> to vector<8x128xf32>
      %15 = arith.addf %12, %14 : vector<8x128xf32>
      %c0_14 = arith.constant 0 : index
      %c0_15 = arith.constant 0 : index
      %16 = vector.load %arg6[%c0_14, %c0_15] : memref<8x128xf32, #tpu.memory_space<vmem>>, vector<8x128xf32>
      tpu.vector_store %arg6[%c0_14, %c0_15], %15 {strides = array<i32>} : memref<8x128xf32, #tpu.memory_space<vmem>>, vector<8x128xf32>,
    } else {
    }
    return
  }
  func.func @transform_0(%arg0: i32, %arg1: i32, %arg2: i32) -> (i32, i32) {
    %c0_i32 = arith.constant 0 : i32
    return %arg0, %arg2 : i32, i32
  }
  func.func @transform_1(%arg0: i32, %arg1: i32, %arg2: i32) -> (i32, i32) {
    %c0_i32 = arith.constant 0 : i32
    return %arg2, %arg1 : i32, i32
  }
  func.func @transform_2(%arg0: i32, %arg1: i32, %arg2: i32) -> (i32, i32) {
    %c0_i32 = arith.constant 0 : i32
    %c0_i32_0 = arith.constant 0 : i32
    return %c0_i32, %arg1 : i32, i32
  }
  func.func @transform_3(%arg0: i32, %arg1: i32, %arg2: i32) -> (i32, i32) {
    %c0_i32 = arith.constant 0 : i32
    return %arg0, %arg1 : i32, i32
  }
}

</mosaic_0001>

<bundles_post_ra>
// kernel: linear_forward.1
= control target key start
LH: loop header
LB: loop body
LE: loop exit
PB: predicated region body
PF: predicated region fallthrough
CT: control target
= control target key end

     0   :  { %8 = vsyncpa [#allocation4], 0  ;;  %s277_s0 = inlined_call_operand.vmem [shape: bf16[8,128], index: 0, kind: input, shape index: {}]   ;;  %s278_s1 = inlined_call_operand.hbm [shape: bf16[128,128], index: 1, kind: input, shape index: {}]   ;;  %s279_s2 = inlined_call_operand.vmem [shape: f32[1,128], index: 2, kind: input, shape index: {}]   ;;  %s280_s3 = inlined_call_operand.hbm [shape: f32[8,128], index: 3, kind: output, shape index: {}]  }
   0x1   :  { %9 = vsyncpa [#allocation5], 0  ;;  %s16_s14 = sshll.u32 %s278_s1, 4  ;;  %s241_s15 = smov [#allocation3]   ;;  %s17_s14 = int_to_ptr.hbm [resolvable:$true] %s16_s14 }
   0x2   :  { %s18_s16 = sshll.u32 %s241_s15, 4  ;;  %s242_s17 = smov 64   ;;  %s19_s16 = int_to_ptr.vmem [resolvable:$true] %s18_s16 }
   0x3   :  { %s243_s18 = smov 4  }
   0x4   :  { %24 = dma.hbm_to_vmem [thread:$0]  %s17_s14, 1024, %s19_s16, [#allocation4], %s242_s17, %s242_s17, %s243_s18  }
   0x5   :  { %237 = dma.done.wait [#allocation4], 1024  }
   0x6   :  { %238 = vsyncadd [#allocation4], 4294966272  ;;  %v183_v0 = vld [vmem:[#allocation3 + $0x38] sm:$0xff]  ;;  %v182_v1 = vld [vmem:[#allocation3 + $0x30] sm:$0xff]  ;;  %s244_s22 = smov [#allocation6]   ;;  %s134_s26 = sshll.u32 %s280_s3, 4  ;;  %s135_s26 = int_to_ptr.hbm [resolvable:$true] %s134_s26 }
   0x7   :  { %102 = vmatpush.bf16.msra.mxu0 %v183_v0  ;;  %v181_v2 = vld [vmem:[#allocation3 + $0x28] sm:$0xff]  ;;  %v180_v3 = vld [vmem:[#allocation3 + $0x20] sm:$0xff]  ;;  %v179_v4 = vld [vmem:[#allocation3 + $0x18] sm:$0xff]  ;;  %s132_s23 = sshll.u32 %s244_s22, 4  ;;  %s133_s23 = int_to_ptr.vmem [resolvable:$true] %s132_s23 }
   0x8   :  { %v178_v5 = vld [vmem:[#allocation3 + $0x10] sm:$0xff]  ;;  %v177_v6 = vld [vmem:[#allocation3 + $0x8] sm:$0xff]  ;;  %v176_v7 = vld [vmem:[#allocation3] sm:$0xff] }
   0x9   :  { %v37_v8 = vld [vmem:[%s277_s0] sm:$0xf] }
   0xa   :  { %v188_v9 = vld [vmem:[%s279_s2] ss:$0 sm:$0xff] }
   0xb   :  { %103 = vmatpush.bf16.msra.mxu0 %v182_v1 }
   0xf   :  { %104 = vmatpush.bf16.msra.mxu0 %v181_v2 }
  0x13   :  { %105 = vmatpush.bf16.msra.mxu0 %v180_v3 }
  0x17   :  { %106 = vmatpush.bf16.msra.mxu0 %v179_v4 }
  0x1b   :  { %107 = vmatpush.bf16.msra.mxu0 %v178_v5 }
  0x1f   :  { %108 = vmatpush.bf16.msra.mxu0 %v177_v6 }
  0x23   :  { %109 = vmatpush.bf16.msra.mxu0 %v176_v7 }
  0x26   :  { %110 = vmatmul.bf16.vlgmr.msra.gmra.mxu0 %v37_v8 }
  0xa3   :  { %v111_v10 = vpop.f32.mrf.mxu0 }
  0xa4   :  { %v125_v11 = vadd.f32 %v188_v9, %v111_v10 }
  0xa6   :  { %126 = vst [vmem:[#allocation6] sm:$0xff] %v125_v11 }
  0xa7   :  { %137 = dma.vmem_to_hbm [thread:$0]  %s133_s23, 128, %s135_s26, [#allocation5]  }
  0xab   :  { %v113_v12 = vpop.f32.mrf.mxu0 }
  0xac   :  { %239 = dma.done.wait [#allocation5], 128  }
  0xad   :  { %240 = vsyncadd [#allocation5], 4294967168 }
  0xae   :  { %142 = vsyncpa [#allocation4], 1 }
  0xaf   :  { %143 = vsyncpa [#allocation5], 1 }

</bundles_post_ra>
